<compile_context>
chip_gen: v7x
topology: tpu7x:2x2x1
jax: 0.10.0
libtpu: 0.0.40
codegen_flags: <defaults>
</compile_context>

<pallas_src>
import numpy as np
import jax
import jax.numpy as jnp
from jax.experimental import pallas as pl
from jax.experimental.pallas import tpu as pltpu


# (in_features, out_features) for the 5 chained Linears.
LAYER_DIMS = [(8, 4), (4, 16), (16, 16), (16, 4), (4, 8)]
IN_FEATURES = LAYER_DIMS[0][0]    # 8
OUT_FEATURES = LAYER_DIMS[-1][1]  # 8

_VMEM = pl.BlockSpec(memory_space=pltpu.MemorySpace.VMEM)


def init_params(key):
    """Deterministic PyTorch-Linear-style init: U(-1/sqrt(fan_in), +1/sqrt(fan_in))."""
    params = []
    for (fan_in, fan_out) in LAYER_DIMS:
        key, kw, kb = jax.random.split(key, 3)
        bound = 1.0 / float(np.sqrt(fan_in))
        w = jax.random.uniform(kw, (fan_out, fan_in), jnp.float32,
                               minval=-bound, maxval=bound)
        b = jax.random.uniform(kb, (1, fan_out), jnp.float32,
                               minval=-bound, maxval=bound)
        params.append((w, b))
    return params


def fold_params(params):
    """Fold the 5-layer affine chain into (W_eff, b_eff).

    params: list of (W, b) with W PyTorch-style (out_features, in_features),
            b shaped (1, out_features).
    Returns numpy arrays: W_eff (IN_FEATURES, OUT_FEATURES) input-major and
            b_eff (1, OUT_FEATURES).
    Exact only because the chain has no nonlinearities (f32 re-association may
    differ from layer-by-layer evaluation by a few ULPs). Forward-only.
    """
    w_eff = jnp.eye(IN_FEATURES, dtype=jnp.float32)
    b_eff = jnp.zeros((1, IN_FEATURES), dtype=jnp.float32)
    for w, b in params:
        w_eff = w_eff @ w.T          # (in, out_layer), input-major
        b_eff = b_eff @ w.T + b      # (1, out_layer)
    return np.asarray(w_eff, np.float32), np.asarray(b_eff, np.float32)


def _cost(batch, param_elems):
    flops = 2 * batch * IN_FEATURES * OUT_FEATURES + batch * OUT_FEATURES
    bytes_accessed = 4 * (batch * IN_FEATURES + param_elems + batch * OUT_FEATURES)
    return pl.CostEstimate(flops=flops, transcendentals=0,
                           bytes_accessed=bytes_accessed)


def make_forward_const(w_eff, b_eff):
    """Preferred path: params are trace-time constants; x is the sole operand."""
    w_const = np.asarray(w_eff, np.float32)   # (8, 8) input-major -> no transpose
    b_const = np.asarray(b_eff, np.float32)   # (1, 8)

    def kernel(x_ref, o_ref):
        y = jnp.dot(x_ref[...], w_const, preferred_element_type=jnp.float32) + b_const
        o_ref[...] = y.astype(o_ref.dtype)

    def forward(x):
        batch = x.shape[0]
        return pl.pallas_call(
            kernel,
            out_shape=jax.ShapeDtypeStruct((batch, OUT_FEATURES), x.dtype),
            in_specs=[_VMEM],
            out_specs=_VMEM,
            cost_estimate=_cost(batch, w_const.size + b_const.size),
        )(x)

    return forward


def make_forward_packed(w_eff, b_eff):
    """Fallback path: packed (9, 8) param slab passed as an explicit second operand."""
    packed = jnp.concatenate(
        [jnp.asarray(w_eff, jnp.float32), jnp.asarray(b_eff, jnp.float32)], axis=0)

    def kernel(x_ref, p_ref, o_ref):
        w = p_ref[0:IN_FEATURES, :]                 # (8, 8) input-major
        b = p_ref[IN_FEATURES:IN_FEATURES + 1, :]   # (1, 8)
        y = jnp.dot(x_ref[...], w, preferred_element_type=jnp.float32) + b
        o_ref[...] = y.astype(o_ref.dtype)

    def forward(x):
        batch = x.shape[0]
        return pl.pallas_call(
            kernel,
            out_shape=jax.ShapeDtypeStruct((batch, OUT_FEATURES), x.dtype),
            in_specs=[_VMEM, _VMEM],
            out_specs=_VMEM,
            cost_estimate=_cost(batch, packed.size),
        )(x, packed)

    return forward


def reference_forward(x, params):
    """Layer-by-layer reference (matches the PyTorch module's forward)."""
    h = x
    for w, b in params:
        h = h @ w.T + b
    return h


if __name__ == "__main__":
    key = jax.random.PRNGKey(0)
    key, kx = jax.random.split(key)
    # Matches NestedWrappedModule.get_input: torch.rand(4, 8)
    x = jax.random.uniform(kx, (4, 8), jnp.float32)

    params = init_params(key)
    w_eff, b_eff = fold_params(params)    # one-time host-side fold

    # Prefer the constant-baked single-operand kernel; fall back to the explicit
    # packed-operand kernel on JAX versions that reject closed-over kernel consts.
    try:
        forward = make_forward_const(w_eff, b_eff)
        out = jax.block_until_ready(forward(x))
    except Exception:
        forward = make_forward_packed(w_eff, b_eff)
        out = jax.block_until_ready(forward(x))

    ref = reference_forward(x, params)
    assert out.shape == (4, 8), out.shape
    assert jnp.allclose(out, ref, atol=1e-5, rtol=1e-4), "mismatch vs reference"

    print("KERNEL_OK")
</pallas_src>

<mosaic_0001>
module attributes {stable_mosaic.version = 11 : i64} {
  func.func @kernel(%arg0: memref<4x8xf32, #tpu.memory_space<vmem>>, %arg1: memref<9x8xf32, #tpu.memory_space<vmem>>, %arg2: memref<4x8xf32, #tpu.memory_space<vmem>>) attributes {dimension_semantics = [], scalar_prefetch = 0 : i64, scratch_operands = 0 : i64, tpu.core_type = #tpu.core_type<tc>} {
    %c0 = arith.constant 0 : index
    %c0_0 = arith.constant 0 : index
    %0 = vector.load %arg1[%c0, %c0_0] : memref<9x8xf32, #tpu.memory_space<vmem>>, vector<8x8xf32>
    %c8 = arith.constant 8 : index
    %c0_1 = arith.constant 0 : index
    %1 = vector.load %arg1[%c8, %c0_1] : memref<9x8xf32, #tpu.memory_space<vmem>>, vector<1x8xf32>
    %c0_2 = arith.constant 0 : index
    %c0_3 = arith.constant 0 : index
    %2 = vector.load %arg0[%c0_2, %c0_3] : memref<4x8xf32, #tpu.memory_space<vmem>>, vector<4x8xf32>
    %cst = arith.constant dense<0.000000e+00> : vector<4x8xf32>
    %3 = tpu.matmul %2, %0, %cst {dimension_numbers = #tpu.dot_dimension_numbers<[1], [0], [0], [1], [0, 0, 1, 1], [], []>} : vector<4x8xf32>, vector<8x8xf32>, vector<4x8xf32> -> vector<4x8xf32>
    %4 = vector.broadcast %1 : vector<1x8xf32> to vector<4x8xf32>
    %5 = arith.addf %3, %4 : vector<4x8xf32>
    %c0_4 = arith.constant 0 : index
    %c0_5 = arith.constant 0 : index
    %6 = vector.load %arg2[%c0_4, %c0_5] : memref<4x8xf32, #tpu.memory_space<vmem>>, vector<4x8xf32>
    tpu.vector_store %arg2[%c0_4, %c0_5], %5 {strides = array<i32>} : memref<4x8xf32, #tpu.memory_space<vmem>>, vector<4x8xf32>,
    return
  }
}

</mosaic_0001>

<bundles_post_ra>
// kernel: tpu_custom_call.1
= control target key start
LH: loop header
LB: loop body
LE: loop exit
PB: predicated region body
PF: predicated region fallthrough
CT: control target
= control target key end

     0   :  { %vm19_vm0 = vcmask 64512   ;;  %v145_v2 = vmov 0.0   ;;  %vm146_vm1 = vmmov 0   ;;  %s184_s0 = inlined_call_operand.vmem [shape: f32[4,8], index: 0, kind: input, shape index: {}]   ;;  %s185_s1 = inlined_call_operand.vmem [shape: f32[9,8], index: 1, kind: input, shape index: {}]   ;;  %s186_s2 = inlined_call_operand.hbm [shape: f32[4,8], index: 2, kind: output, shape index: {}]  }
   0x1   :  { %v12_v0 = vld [vmem:[%s185_s1] sm:$0xff]  ;;  %113 = vmatprep.subr.mxu0 %v145_v2  ;;  %115 = vmatprep.mubr.msk.f32.mxu0 %vm146_vm1, %v145_v2 }
   0x2   :  { %v14_v1 = vld [vmem:[%s184_s0] sm:$0xf] }
   0x3   :  { %7 = vsyncpa [#allocation3], 0  ;;  %114 = vmatpush3.msra.mxu0 %v12_v0  ;;  %v109_v3 = vld [vmem:[%s185_s1 + $0x8] ss:$0 sm:$0xff]  ;;  %s147_s15 = smov [#allocation2]   ;;  %vm93_vm2 = vcmask 60416  }
   0x4   :  { %116 = vmatmul.mubr.msk.f32.vlgmr.msra.gmra.mrb[0].mxu0 %vm19_vm0, %v14_v1  ;;  %s101_s16 = sshll.u32 %s147_s15, 4  ;;  %s102_s16 = int_to_ptr.vmem [resolvable:$true] %s101_s16 }
   0x5   :  { %s121_s0 = scalar_lea.vmem %s102_s16, 64  ;;  %p126_p1 = scmp.lt.s32.totalorder %s102_s16, %s102_s16 }
   0x6   :  { %p122_p0 = scmp.ne.s32.totalorder %s102_s16, %s121_s0  ;;  %p127_p2 = scmp.lt.s32.totalorder %s121_s0, %s121_s0 }
   0x8   :  { %p128_p3 = por %p127_p2, %p126_p1 }
   0xa   :  { %p129_p4 = pnand %p128_p3, %p122_p0 }
  0xd7   :  { %v89_v4 = vpop.f32.mrb[0].mxu0 }
  0xd8   :  { %v90_v5 = vadd.f32 %v109_v3, %v89_v4  ;;  %v117_v6 = vpop.f32.mrb[1].mxu0 }
  0xda   :  { %94 = vst.msk [vmem:[#allocation2] sm:$0xf] %vm93_vm2, %v90_v5 }
  0xdb   :  { %132 = shalt.err (!%p129_p4)
}
  0xdc   :  { %s133_s19 = scalar_lea.hbm %s186_s2, 64 }
  0xdd   :  { %p134_p5 = scmp.ne.s32.totalorder %s186_s2, %s133_s19  ;;  %p137_p6 = scmp.lt.u32.totalorder %s133_s19, %s186_s2 }
  0xdf   :  { %p139_p7 = pnand %p137_p6, %p134_p5 }
  0xe1   :  { %142 = shalt.err (!%p139_p7)
}
  0xe2   :  { %104 = dma.vmem_to_hbm [thread:$0]  %s102_s16, 64, %s186_s2, [#allocation3]  }
  0xe3   :  { %143 = dma.done.wait [#allocation3], 64  }
  0xe4   :  { %144 = vsyncadd [#allocation3], 4294967232 }
  0xe5   :  { %108 = vsyncpa [#allocation3], 1 }

</bundles_post_ra>
